<compile_context>
chip_gen: v6e
topology: v6e:2x2x1
jax: 0.10.0
libtpu: 0.0.40
codegen_flags: <defaults>
</compile_context>

<pallas_src>
import math
from functools import partial

import jax
import jax.numpy as jnp
from jax.experimental import pallas as pl
from jax.experimental.pallas import tpu as pltpu


# ----------------------------------------------------------------------------
# Fused Pallas kernel: linear + bias + residual + LayerNorm on a row tile
# ----------------------------------------------------------------------------

def _self_output_kernel(x_ref, res_ref, w_ref, b_ref, g_ref, beta_ref, o_ref,
                        *, eps):
    # x_ref/res_ref/o_ref: (TM, H); w_ref: (H, H); b/g/beta: (1, H)
    x = x_ref[...]
    # MXU matmul with f32 accumulation.
    y = jnp.dot(x, w_ref[...], preferred_element_type=jnp.float32)
    y = y + b_ref[...].astype(jnp.float32)

    # Dropout is identity in eval mode (inference semantics).
    z = y + res_ref[...].astype(jnp.float32)

    # LayerNorm over the hidden axis (matches torch: biased variance, eps inside sqrt).
    u = jnp.mean(z, axis=-1, keepdims=True)
    d = z - u
    var = jnp.mean(d * d, axis=-1, keepdims=True)
    inv = jax.lax.rsqrt(var + eps)          # EUP transcendental slot
    out = d * inv * g_ref[...].astype(jnp.float32) + beta_ref[...].astype(jnp.float32)
    o_ref[...] = out.astype(o_ref.dtype)


def self_output_forward(params, hidden_states, input_tensor, *, tm=256):
    """hidden_states, input_tensor: (B, L, H) -> (B, L, H)"""
    B, L, H = hidden_states.shape
    M = B * L
    x2 = hidden_states.reshape(M, H)
    r2 = input_tensor.reshape(M, H)

    # Row-tile size: big tiles amortize per-step overhead; keep it (8,*) friendly.
    TM = min(tm, M)
    if TM != M and TM % 8 != 0:
        TM = max(8, (TM // 8) * 8)
    grid = (pl.cdiv(M, TM),)

    # VMEM budget: double-buffered x/res/out tiles + resident W + small vectors.
    vmem_need = 4 * (3 * 2 * TM * H + H * H + 8 * H)
    vmem_limit = int(min(max(2 * vmem_need, 16 * 1024 * 1024), 60 * 1024 * 1024))

    kern = partial(_self_output_kernel, eps=params["eps"])
    row_spec = pl.BlockSpec((TM, H), lambda i: (i, 0))
    vec_spec = pl.BlockSpec((1, H), lambda i: (0, 0))

    out = pl.pallas_call(
        kern,
        out_shape=jax.ShapeDtypeStruct((M, H), hidden_states.dtype),
        grid=grid,
        in_specs=[
            row_spec,                                   # hidden_states tile
            row_spec,                                   # input_tensor (residual) tile
            pl.BlockSpec((H, H), lambda i: (0, 0)),     # weight, resident in VMEM
            vec_spec,                                   # bias
            vec_spec,                                   # gamma
            vec_spec,                                   # beta
        ],
        out_specs=row_spec,
        compiler_params=pltpu.CompilerParams(
            dimension_semantics=("parallel",),
            vmem_limit_bytes=vmem_limit,
        ),
    )(x2, r2, params["W"], params["b"].reshape(1, H),
      params["gamma"].reshape(1, H), params["beta"].reshape(1, H))
    return out.reshape(B, L, H)


# ----------------------------------------------------------------------------
# Params and pure-JAX reference (mirrors the PyTorch math)
# ----------------------------------------------------------------------------

def init_params(key, hidden_size, eps=1e-12):
    k_w, k_b = jax.random.split(key)
    limit = math.sqrt(6.0 / (hidden_size + hidden_size))
    return {
        # Stored as (in_features, out_features): y = x @ W + b == torch Linear.
        "W": jax.random.uniform(k_w, (hidden_size, hidden_size),
                                jnp.float32, -limit, limit),
        "b": jax.random.uniform(k_b, (hidden_size,), jnp.float32, -0.05, 0.05),
        "gamma": jnp.ones((hidden_size,), jnp.float32),
        "beta": jnp.zeros((hidden_size,), jnp.float32),
        "eps": eps,
    }


def reference_forward(params, hidden_states, input_tensor):
    y = hidden_states @ params["W"] + params["b"]
    z = y + input_tensor                       # dropout is identity in eval mode
    u = jnp.mean(z, axis=-1, keepdims=True)
    s = jnp.mean((z - u) ** 2, axis=-1, keepdims=True)
    zn = (z - u) / jnp.sqrt(s + params["eps"])
    return params["gamma"] * zn + params["beta"]


if __name__ == "__main__":
    B, L, H = 2, 8, 32   # batch, seq, hidden

    key = jax.random.PRNGKey(0)
    k_param, k_hidden, k_residual = jax.random.split(key, 3)
    params = init_params(k_param, H)
    hidden_states = jax.random.normal(k_hidden, (B, L, H), dtype=jnp.float32)
    input_tensor = jax.random.normal(k_residual, (B, L, H), dtype=jnp.float32)

    out = self_output_forward(params, hidden_states, input_tensor)
    out = jax.block_until_ready(out)

    ref = reference_forward(params, hidden_states, input_tensor)
    assert out.shape == (B, L, H)
    assert jnp.allclose(out, ref, atol=1e-4, rtol=1e-4), "mismatch vs JAX reference"

    print("KERNEL_OK")
</pallas_src>

<mosaic_0001>
module attributes {stable_mosaic.version = 11 : i64} {
  func.func @_self_output_kernel(%arg0: i32, %arg1: memref<16x32xf32, #tpu.memory_space<vmem>>, %arg2: memref<16x32xf32, #tpu.memory_space<vmem>>, %arg3: memref<32x32xf32, #tpu.memory_space<vmem>>, %arg4: memref<1x32xf32, #tpu.memory_space<vmem>>, %arg5: memref<1x32xf32, #tpu.memory_space<vmem>>, %arg6: memref<1x32xf32, #tpu.memory_space<vmem>>, %arg7: memref<16x32xf32, #tpu.memory_space<vmem>>) attributes {dimension_semantics = [#tpu.dimension_semantics<parallel>], iteration_bounds = array<i64: 1>, scalar_prefetch = 0 : i64, scratch_operands = 0 : i64, tpu.core_type = #tpu.core_type<tc>, window_params = [{transform_indices = @transform_0, window_bounds = array<i64: 16, 32>}, {transform_indices = @transform_1, window_bounds = array<i64: 16, 32>}, {pipeline_mode = #tpu.pipeline_mode<synchronous>, transform_indices = @transform_2, window_bounds = array<i64: 32, 32>}, {pipeline_mode = #tpu.pipeline_mode<synchronous>, transform_indices = @transform_3, window_bounds = array<i64: 1, 32>}, {pipeline_mode = #tpu.pipeline_mode<synchronous>, transform_indices = @transform_4, window_bounds = array<i64: 1, 32>}, {pipeline_mode = #tpu.pipeline_mode<synchronous>, transform_indices = @transform_5, window_bounds = array<i64: 1, 32>}, {transform_indices = @transform_6, window_bounds = array<i64: 16, 32>}]} {
    %c0 = arith.constant 0 : index
    %c0_0 = arith.constant 0 : index
    %0 = vector.load %arg1[%c0, %c0_0] : memref<16x32xf32, #tpu.memory_space<vmem>>, vector<16x32xf32>
    %c0_1 = arith.constant 0 : index
    %c0_2 = arith.constant 0 : index
    %1 = vector.load %arg3[%c0_1, %c0_2] : memref<32x32xf32, #tpu.memory_space<vmem>>, vector<32x32xf32>
    %cst = arith.constant dense<0.000000e+00> : vector<16x32xf32>
    %2 = tpu.matmul %0, %1, %cst {dimension_numbers = #tpu.dot_dimension_numbers<[1], [0], [0], [1], [0, 0, 1, 1], [], []>} : vector<16x32xf32>, vector<32x32xf32>, vector<16x32xf32> -> vector<16x32xf32>
    %c0_3 = arith.constant 0 : index
    %c0_4 = arith.constant 0 : index
    %3 = vector.load %arg4[%c0_3, %c0_4] : memref<1x32xf32, #tpu.memory_space<vmem>>, vector<1x32xf32>
    %4 = vector.broadcast %3 : vector<1x32xf32> to vector<16x32xf32>
    %5 = arith.addf %2, %4 : vector<16x32xf32>
    %c0_5 = arith.constant 0 : index
    %c0_6 = arith.constant 0 : index
    %6 = vector.load %arg2[%c0_5, %c0_6] : memref<16x32xf32, #tpu.memory_space<vmem>>, vector<16x32xf32>
    %7 = arith.addf %5, %6 : vector<16x32xf32>
    %cst_7 = arith.constant dense<0.000000e+00> : vector<16xf32>
    %8 = vector.multi_reduction <add>, %7, %cst_7 [1] : vector<16x32xf32> to vector<16xf32>
    %9 = vector.shape_cast %8 : vector<16xf32> to vector<16x1xf32>
    %cst_8 = arith.constant 3.200000e+01 : f32
    %10 = vector.broadcast %cst_8 : f32 to vector<16x1xf32>
    %11 = arith.divf %9, %10 : vector<16x1xf32>
    %12 = vector.broadcast %11 : vector<16x1xf32> to vector<16x32xf32>
    %13 = arith.subf %7, %12 : vector<16x32xf32>
    %14 = arith.mulf %13, %13 : vector<16x32xf32>
    %cst_9 = arith.constant dense<0.000000e+00> : vector<16xf32>
    %15 = vector.multi_reduction <add>, %14, %cst_9 [1] : vector<16x32xf32> to vector<16xf32>
    %16 = vector.shape_cast %15 : vector<16xf32> to vector<16x1xf32>
    %cst_10 = arith.constant 3.200000e+01 : f32
    %17 = vector.broadcast %cst_10 : f32 to vector<16x1xf32>
    %18 = arith.divf %16, %17 : vector<16x1xf32>
    %cst_11 = arith.constant 9.99999996E-13 : f32
    %19 = vector.broadcast %cst_11 : f32 to vector<16x1xf32>
    %20 = arith.addf %18, %19 : vector<16x1xf32>
    %21 = math.rsqrt %20 : vector<16x1xf32>
    %22 = vector.broadcast %21 : vector<16x1xf32> to vector<16x32xf32>
    %23 = arith.mulf %13, %22 : vector<16x32xf32>
    %c0_12 = arith.constant 0 : index
    %c0_13 = arith.constant 0 : index
    %24 = vector.load %arg5[%c0_12, %c0_13] : memref<1x32xf32, #tpu.memory_space<vmem>>, vector<1x32xf32>
    %25 = vector.broadcast %24 : vector<1x32xf32> to vector<16x32xf32>
    %26 = arith.mulf %23, %25 : vector<16x32xf32>
    %c0_14 = arith.constant 0 : index
    %c0_15 = arith.constant 0 : index
    %27 = vector.load %arg6[%c0_14, %c0_15] : memref<1x32xf32, #tpu.memory_space<vmem>>, vector<1x32xf32>
    %28 = vector.broadcast %27 : vector<1x32xf32> to vector<16x32xf32>
    %29 = arith.addf %26, %28 : vector<16x32xf32>
    %c0_16 = arith.constant 0 : index
    %c0_17 = arith.constant 0 : index
    %30 = vector.load %arg7[%c0_16, %c0_17] : memref<16x32xf32, #tpu.memory_space<vmem>>, vector<16x32xf32>
    tpu.vector_store %arg7[%c0_16, %c0_17], %29 {strides = array<i32>} : memref<16x32xf32, #tpu.memory_space<vmem>>, vector<16x32xf32>,
    return
  }
  func.func @transform_0(%arg0: i32) -> (i32, i32) {
    %c0_i32 = arith.constant 0 : i32
    %c0_i32_0 = arith.constant 0 : i32
    return %arg0, %c0_i32 : i32, i32
  }
  func.func @transform_1(%arg0: i32) -> (i32, i32) {
    %c0_i32 = arith.constant 0 : i32
    %c0_i32_0 = arith.constant 0 : i32
    return %arg0, %c0_i32 : i32, i32
  }
  func.func @transform_2(%arg0: i32) -> (i32, i32) {
    %c0_i32 = arith.constant 0 : i32
    %c0_i32_0 = arith.constant 0 : i32
    %c0_i32_1 = arith.constant 0 : i32
    return %c0_i32, %c0_i32_0 : i32, i32
  }
  func.func @transform_3(%arg0: i32) -> (i32, i32) {
    %c0_i32 = arith.constant 0 : i32
    %c0_i32_0 = arith.constant 0 : i32
    %c0_i32_1 = arith.constant 0 : i32
    return %c0_i32, %c0_i32_0 : i32, i32
  }
  func.func @transform_4(%arg0: i32) -> (i32, i32) {
    %c0_i32 = arith.constant 0 : i32
    %c0_i32_0 = arith.constant 0 : i32
    %c0_i32_1 = arith.constant 0 : i32
    return %c0_i32, %c0_i32_0 : i32, i32
  }
  func.func @transform_5(%arg0: i32) -> (i32, i32) {
    %c0_i32 = arith.constant 0 : i32
    %c0_i32_0 = arith.constant 0 : i32
    %c0_i32_1 = arith.constant 0 : i32
    return %c0_i32, %c0_i32_0 : i32, i32
  }
  func.func @transform_6(%arg0: i32) -> (i32, i32) {
    %c0_i32 = arith.constant 0 : i32
    %c0_i32_0 = arith.constant 0 : i32
    return %arg0, %c0_i32 : i32, i32
  }
}

</mosaic_0001>

<bundles_post_ra>
// kernel: tpu_custom_call.1
= control target key start
LH: loop header
LB: loop body
LE: loop exit
PB: predicated region body
PF: predicated region fallthrough
CT: control target
= control target key end

     0   :  { %11 = vsyncpa [#allocation3], 0  ;;  %s429_s0 = inlined_call_operand.hbm [shape: f32[16,32], index: 0, kind: input, shape index: {}]   ;;  %s430_s1 = inlined_call_operand.hbm [shape: f32[16,32], index: 1, kind: input, shape index: {}]   ;;  %s431_s2 = inlined_call_operand.hbm [shape: f32[32,32], index: 2, kind: input, shape index: {}]   ;;  %s432_s3 = inlined_call_operand.vmem [shape: f32[1,32], index: 3, kind: input, shape index: {}]   ;;  %s433_s4 = inlined_call_operand.vmem [shape: f32[1,32], index: 4, kind: input, shape index: {}]   ;;  %s434_s5 = inlined_call_operand.vmem [shape: f32[1,32], index: 5, kind: input, shape index: {}]   ;;  %s435_s6 = inlined_call_operand.hbm [shape: f32[16,32], index: 6, kind: output, shape index: {}]  }
   0x1   :  { %12 = vsyncpa [#allocation6], 0 }
   0x2   :  { %13 = vsyncpa [#allocation4], 0  ;;  %s347_s21 = smov [#allocation5]   ;;  %s348_s23 = smov [#allocation2]  }
   0x3   :  { %s31_s22 = sshll.u32 %s347_s21, 4  ;;  %s19_s24 = sshll.u32 %s348_s23, 4  ;;  %s32_s22 = int_to_ptr.vmem [resolvable:$true] %s31_s22  ;;  %s20_s24 = int_to_ptr.vmem [resolvable:$true] %s19_s24 }
   0x4   :  { %s269_s25 = scalar_lea.vmem %s32_s22, 256  ;;  %p274_p1 = scmp.lt.s32.totalorder %s32_s22, %s32_s22 }
   0x5   :  { %p270_p0 = scmp.ne.s32.totalorder %s32_s22, %s269_s25  ;;  %p275_p2 = scmp.lt.s32.totalorder %s269_s25, %s269_s25 }
   0x7   :  { %p276_p3 = por %p275_p2, %p274_p1 }
   0x9   :  { %p277_p4 = pnand %p276_p3, %p270_p0 }
   0xb   :  { %280 = shalt.err (!%p277_p4)
}
   0xc   :  { %s349_s26 = smov 128   ;;  %s350_s27 = smov 8  }
   0xd   :  { %37 = dma.hbm_to_vmem [thread:$0]  %s430_s1, 256, %s32_s22, [#allocation6], %s349_s26, %s349_s26, %s350_s27  }
   0xe   :  { %s289_s30 = scalar_lea.vmem %s20_s24, 256  ;;  %p294_p6 = scmp.lt.s32.totalorder %s20_s24, %s20_s24 }
   0xf   :  { %p290_p5 = scmp.ne.s32.totalorder %s20_s24, %s289_s30  ;;  %p295_p7 = scmp.lt.s32.totalorder %s289_s30, %s289_s30 }
  0x11   :  { %p296_p8 = por %p295_p7, %p294_p6 }
  0x13   :  { %p297_p9 = pnand %p296_p8, %p290_p5 }
  0x15   :  { %300 = shalt.err (!%p297_p9)
}
  0x16   :  { %25 = dma.hbm_to_vmem [thread:$0]  %s429_s0, 256, %s20_s24, [#allocation3], %s349_s26, %s349_s26, %s350_s27  }
  0x17   :  { %s351_s9 = smov [#allocation7]  }
  0x18   :  { %s43_s10 = sshll.u32 %s351_s9, 4  ;;  %s44_s10 = int_to_ptr.vmem [resolvable:$true] %s43_s10 }
  0x19   :  { %s309_s11 = scalar_lea.vmem %s44_s10, 512  ;;  %p314_p11 = scmp.lt.s32.totalorder %s44_s10, %s44_s10 }
  0x1a   :  { %p310_p10 = scmp.ne.s32.totalorder %s44_s10, %s309_s11  ;;  %p315_p12 = scmp.lt.s32.totalorder %s309_s11, %s309_s11 }
  0x1c   :  { %p316_p13 = por %p315_p12, %p314_p11 }
  0x1e   :  { %p317_p0 = pnand %p316_p13, %p310_p10 }
  0x20   :  { %320 = shalt.err (!%p317_p0)
}
  0x21   :  { %49 = dma.hbm_to_vmem [thread:$0]  %s431_s2, 512, %s44_s10, [#allocation6], %s349_s26, %s349_s26, %s350_s27  }
  0x22   :  { %341 = dma.done.wait [#allocation3], 256  }
  0x23   :  { %342 = vsyncadd [#allocation3], 4294967040 }
  0x24   :  { %343 = dma.done.wait [#allocation6], 768  }
  0x25   :  { %344 = vsyncadd [#allocation6], 4294966528  ;;  %vm78_vm0 = vcmask 261120   ;;  %v70_v0 = vld [vmem:[#allocation7 + $0x18] sm:$0xff]  ;;  %v69_v1 = vld [vmem:[#allocation7 + $0x10] sm:$0xff]  ;;  %s352_s16 = smov [#allocation8]  }
  0x26   :  { %240 = vmatprep.subr.mxu0 %v70_v0  ;;  %v65_v2 = vld [vmem:[#allocation2] sm:$0xff]  ;;  %v68_v3 = vld [vmem:[#allocation7 + $0x8] sm:$0xff]  ;;  %v160_v9 = vld [vmem:[#allocation5] sm:$0xff]  ;;  %s216_s17 = sshll.u32 %s352_s16, 4  ;;  %s217_s17 = int_to_ptr.vmem [resolvable:$true] %s216_s17 }
  0x27   :  { %241 = vmatpush3.msra.mxu0 %v70_v0  ;;  %248 = vmatprep.mubr.msk.f32.mxu0 %vm78_vm0, %v65_v2  ;;  %v67_v4 = vld [vmem:[#allocation7] sm:$0xff]  ;;  %v66_v5 = vld [vmem:[#allocation2 + $0x8] sm:$0xff]  ;;  %v161_v12 = vld [vmem:[#allocation5 + $0x8] sm:$0xff]  ;;  %s321_s18 = scalar_lea.vmem %s217_s17, 256  ;;  %p326_p2 = scmp.lt.s32.totalorder %s217_s17, %s217_s17 }
  0x28   :  { %242 = vmatprep.subr.mxu0 %v69_v1  ;;  %v229_v7 = vld [vmem:[%s432_s3] ss:$0 sm:$0xff]  ;;  %p322_p1 = scmp.ne.s32.totalorder %s217_s17, %s321_s18  ;;  %p327_p3 = scmp.lt.s32.totalorder %s321_s18, %s321_s18 }
  0x29   :  { %243 = vmatpush3.msra.mxu0 %v69_v1  ;;  %v232_v34 = vld [vmem:[%s433_s4] ss:$0 sm:$0xff] }
  0x2a   :  { %244 = vmatprep.subr.mxu0 %v68_v3  ;;  %v233_v36 = vld [vmem:[%s434_s5] ss:$0 sm:$0xff]  ;;  %p328_p4 = por %p327_p3, %p326_p2 }
  0x2b   :  { %245 = vmatpush3.msra.mxu0 %v68_v3 }
  0x2c   :  { %246 = vmatprep.subr.mxu0 %v67_v4  ;;  %p329_p5 = pnand %p328_p4, %p322_p1 }
  0x2d   :  { %247 = vmatpush3.msra.mxu0 %v67_v4 }
  0x2e   :  { %249 = vmatmul.mubr.msk.f32.vlgmr.msra.gmra.mxu0 %vm78_vm0, %v66_v5 }
  0xee   :  { %v250_v6 = vpop.f32.mrf.mxu0 }
  0xef   :  { %v157_v10 = vadd.f32 %v250_v6, %v229_v7 }
  0xf0   :  { %v151_v8 = vpop.f32.mrf.mxu0 }
  0xf1   :  { %v152_v11 = vadd.f32 %v229_v7, %v151_v8  ;;  %v163_v15 = vadd.f32 %v161_v12, %v157_v10 }
  0xf3   :  { %v162_v13 = vadd.f32 %v160_v9, %v152_v11  ;;  %v167_v16 = vsel %vm78_vm0, %v163_v15, 0.0 }
  0xf5   :  { %v164_v14 = vsel %vm78_vm0, %v162_v13, 0.0 }
  0xf6   :  { %165 = vadd.xlane.f32.xlu0 %v164_v14 }
  0xfa   :  { %168 = vadd.xlane.f32.xlu0 %v167_v16 }
 0x17f   :  { %v166_v17 = vpop.xlane.xlu0 %165 }
 0x180   :  { %v171_v18 = vmul.f32 0.03125, %v166_v17 }
 0x182   :  { %v173_v19 = vsub.f32 %v162_v13, %v171_v18 }
 0x183   :  { %v169_v20 = vpop.xlane.xlu0 %168 }
 0x184   :  { %v172_v21 = vmul.f32 0.03125, %v169_v20  ;;  %v175_v22 = vmul.f32 %v173_v19, %v173_v19 }
 0x186   :  { %v174_v23 = vsub.f32 %v163_v15, %v172_v21  ;;  %v177_v24 = vsel %vm78_vm0, %v175_v22, 0.0 }
 0x187   :  { %178 = vadd.xlane.f32.xlu1 %v177_v24 }
 0x188   :  { %v176_v25 = vmul.f32 %v174_v23, %v174_v23 }
 0x18a   :  { %v180_v26 = vsel %vm78_vm0, %v176_v25, 0.0 }
 0x18b   :  { %181 = vadd.xlane.f32.xlu1 %v180_v26 }
 0x210   :  { %v179_v27 = vpop.xlane.xlu1 %178 }
 0x211   :  { %v183_v28 = vmul.f32 0.03125, %v179_v27 }
 0x213   :  { %v185_v29 = vadd.f32 1e-12, %v183_v28 }
 0x214   :  { %v182_v30 = vpop.xlane.xlu1 %181 }
 0x215   :  { %257 = vrsqrt.f32 %v185_v29  ;;  %v184_v31 = vmul.f32 0.03125, %v182_v30 }
 0x217   :  { %v186_v32 = vadd.f32 1e-12, %v184_v31 }
 0x219   :  { %259 = vrsqrt.f32 %v186_v32 }
 0x222   :  { %v258_v33 = vpop.eup %257 }
 0x223   :  { %v189_v35 = vmul.f32 %v258_v33, %v173_v19 }
 0x225   :  { %v198_v37 = vmul.f32 %v232_v34, %v189_v35 }
 0x226   :  { %v260_v38 = vpop.eup %259 }
 0x227   :  { %v190_v39 = vmul.f32 %v260_v38, %v174_v23  ;;  %v207_v40 = vadd.f32 %v233_v36, %v198_v37 }
 0x229   :  { %v199_v41 = vmul.f32 %v232_v34, %v190_v39  ;;  %209 = vst.msk [vmem:[#allocation8] sm:$0xff] %vm78_vm0, %v207_v40 }
 0x22b   :  { %v208_v42 = vadd.f32 %v233_v36, %v199_v41 }
 0x22d   :  { %210 = vst.msk [vmem:[#allocation8 + $0x8] sm:$0xff] %vm78_vm0, %v208_v42 }
 0x22e   :  { %332 = shalt.err (!%p329_p5)
}
 0x22f   :  { %222 = dma.vmem_to_hbm [thread:$0]  %s217_s17, 256, %s435_s6, [#allocation4], %s349_s26, %s349_s26, %s350_s27  }
 0x230   :  { %345 = dma.done.wait [#allocation4], 256  }
 0x231   :  { %346 = vsyncadd [#allocation4], 4294967040 }
 0x232   :  { %226 = vsyncpa [#allocation3], 1 }
 0x233   :  { %227 = vsyncpa [#allocation6], 1 }
 0x234   :  { %228 = vsyncpa [#allocation4], 1 }

</bundles_post_ra>
